<compile_context>
chip_gen: v5e
topology: v5e:2x2
jax: 0.10.0
libtpu: 0.0.40
codegen_flags: <defaults>
</compile_context>

<pallas_src>
import math
from functools import partial

import jax
import jax.numpy as jnp
from jax import lax
from jax.experimental import pallas as pl
from jax.experimental.pallas import tpu as pltpu


def _attn_kernel(x_ref, wqkv_t_ref, wo_t_ref, o_ref, *, block_b, chan,
                 compute_dtype):
    """Single-head self-attention on `block_b` batch elements, channel-major.

    x_ref     : (block_b, C, S)   tokens, channels on sublanes / S on lanes
    wqkv_t_ref: (3C, C)           fused [wq.T*scale ; wk.T ; wv.T]
    wo_t_ref  : (C, C)            wo.T
    o_ref     : (block_b, C, S)   output, same lane-dense layout
    """
    wqkv_t = wqkv_t_ref[...].astype(compute_dtype)
    wo_t = wo_t_ref[...].astype(compute_dtype)

    # Unrolled per-batch loop (block_b <= 4).  Per the review: no tall-M slab;
    # the MXU K dim (C) is the limiter, so per-batch dots cost nothing extra
    # and avoid the concat/slice VMEM copies.
    # TODO(synk): convert to lax.fori_loop if block_b or S grows enough that
    # multiple live (S, S) score matrices threaten the VMEM limit (v7x: 64 MiB).
    for bi in range(block_b):
        x = x_ref[bi].astype(compute_dtype)                        # (C, S)

        # Fused QKV projection: (3C, C) x (C, S) -> (3C, S).  Scale on q is
        # already folded into the weights.
        qkv = lax.dot_general(wqkv_t, x, (((1,), (0,)), ((), ())),
                              preferred_element_type=jnp.float32)  # (3C, S)
        q = qkv[:chan]                                             # (C, Sq)
        k = qkv[chan:2 * chan]                                     # (C, Sk)
        v = qkv[2 * chan:]                                         # (C, Sk)

        # Scores with the key axis on sublanes: (Sk, Sq).  Softmax reductions
        # over axis 0 are cheap sublane (VPU) reductions, no XLU.
        s = lax.dot_general(k.astype(compute_dtype), q.astype(compute_dtype),
                            (((0,), (0,)), ((), ())),
                            preferred_element_type=jnp.float32)    # (Sk, Sq)
        s = s - jnp.max(s, axis=0, keepdims=True)
        p = jnp.exp(s)                                             # f32
        denom = jnp.sum(p, axis=0, keepdims=True)                  # (1, Sq)

        # EUP approximate reciprocal + one Newton-Raphson step (~f32 accurate).
        inv = pl.reciprocal(denom, approx=True)
        inv = inv * (2.0 - denom * inv)

        # o = v @ p : (C, Sk) x (Sk, Sq) -> (C, Sq); normalize the small (C, S)
        # tensor instead of the (S, S) probability matrix.
        o = lax.dot_general(v.astype(compute_dtype), p.astype(compute_dtype),
                            (((1,), (0,)), ((), ())),
                            preferred_element_type=jnp.float32)    # (C, Sq)
        o = o * inv

        # Output projection, still channel-major: (C, C) x (C, Sq) -> (C, Sq).
        out = lax.dot_general(wo_t, o.astype(compute_dtype),
                              (((1,), (0,)), ((), ())),
                              preferred_element_type=jnp.float32)  # (C, Sq)
        o_ref[bi] = out.astype(o_ref.dtype)


def _pick_block_b(b, cap=4):
    """Largest divisor of b that is <= cap while leaving >= 2 grid steps, so
    the 'parallel' batch axis shards across both TensorCores on v7x.  On
    single-TC chips (v5e/v6e) the extra grid steps only cost ~0.35 us each."""
    best = 1
    for cand in range(1, min(b, cap) + 1):
        if b % cand == 0 and b // cand >= 2:
            best = cand
    return best


def prepare_attention_weights(wq, wk, wv, wo):
    """One-time parameter preprocessing (off the kernel critical path):
    fuse q/k/v weights along the sublane (output-channel) axis, transpose for
    the channel-major dataflow, and fold the 1/sqrt(C) scale into wq."""
    c = wq.shape[0]
    scale = 1.0 / math.sqrt(c)
    wqkv_t = jnp.concatenate([wq.T * scale, wk.T, wv.T], axis=0)   # (3C, C)
    wo_t = wo.T                                                    # (C, C)
    return wqkv_t, wo_t


def einops_to_and_from(x, wqkv_t, wo_t, *, block_b=None,
                       compute_dtype=jnp.float32):
    """EinopsToAndFrom('b c h w', 'b (h w) c', fn=single-head attention)."""
    b, c, h, w = x.shape
    s = h * w
    assert wqkv_t.shape == (3 * c, c) and wo_t.shape == (c, c)

    # 'b c h w -> b c (h w)' is a pure reshape (no HBM traffic); the kernel
    # consumes the NCHW layout directly (channel-major, S on lanes).
    x3 = x.reshape(b, c, s)

    if block_b is None:
        block_b = _pick_block_b(b)
    assert b % block_b == 0
    grid_b = b // block_b

    kernel = partial(_attn_kernel, block_b=block_b, chan=c,
                     compute_dtype=compute_dtype)

    out = pl.pallas_call(
        kernel,
        out_shape=jax.ShapeDtypeStruct((b, c, s), x.dtype),
        grid_spec=pltpu.PrefetchScalarGridSpec(
            num_scalar_prefetch=0,
            grid=(grid_b,),
            in_specs=[
                pl.BlockSpec((block_b, c, s), lambda i: (i, 0, 0)),
                pl.BlockSpec((3 * c, c), lambda i: (0, 0)),
                pl.BlockSpec((c, c), lambda i: (0, 0)),
            ],
            out_specs=pl.BlockSpec((block_b, c, s), lambda i: (i, 0, 0)),
        ),
        compiler_params=pltpu.CompilerParams(
            dimension_semantics=("parallel",),
            # Explicit scoped-VMEM limit: above the v5e (16 MiB) / v7x (32 MiB)
            # defaults, well inside every generation's physical VMEM.
            vmem_limit_bytes=32 * 1024 * 1024,
        ),
    )(x3, wqkv_t, wo_t)

    # 'b c (h w) -> b c h w': again a pure reshape, no data movement.
    return out.reshape(b, c, h, w)


def _reference(x, wq, wk, wv, wo):
    """Pure-JAX reference for correctness checking (token-major, like torch)."""
    b, c, h, w = x.shape
    xt = jnp.transpose(x, (0, 2, 3, 1)).reshape(b, h * w, c).astype(jnp.float32)
    q = xt @ wq
    k = xt @ wk
    v = xt @ wv
    s = jnp.einsum("bqc,bkc->bqk", q, k) / math.sqrt(c)
    p = jax.nn.softmax(s, axis=-1)
    o = jnp.einsum("bqk,bkc->bqc", p, v) @ wo
    return jnp.transpose(o.reshape(b, h, w, c), (0, 3, 1, 2)).astype(x.dtype)


if __name__ == "__main__":
    key = jax.random.PRNGKey(0)
    kx, kq, kk, kv, ko = jax.random.split(key, 5)

    B, C, H, W = 2, 32, 16, 16
    x = jax.random.normal(kx, (B, C, H, W), dtype=jnp.float32)

    # Deterministic synthetic parameters (fn = single-head attention, dim=C).
    wq = jax.random.normal(kq, (C, C), dtype=jnp.float32) * (1.0 / math.sqrt(C))
    wk = jax.random.normal(kk, (C, C), dtype=jnp.float32) * (1.0 / math.sqrt(C))
    wv = jax.random.normal(kv, (C, C), dtype=jnp.float32) * (1.0 / math.sqrt(C))
    wo = jax.random.normal(ko, (C, C), dtype=jnp.float32) * (1.0 / math.sqrt(C))

    wqkv_t, wo_t = prepare_attention_weights(wq, wk, wv, wo)

    out = einops_to_and_from(x, wqkv_t, wo_t)
    out = jax.block_until_ready(out)

    ref = _reference(x, wq, wk, wv, wo)
    assert out.shape == x.shape, (out.shape, x.shape)
    # Newton-refined reciprocal + f32 accumulation -> tight agreement.
    assert jnp.allclose(out, ref, atol=1e-3, rtol=1e-3), "mismatch vs reference"

    print("KERNEL_OK")
</pallas_src>

<mosaic_0001>
module attributes {stable_mosaic.version = 11 : i64} {
  func.func @_attn_kernel(%arg0: i32, %arg1: memref<1x32x256xf32, #tpu.memory_space<vmem>>, %arg2: memref<96x32xf32, #tpu.memory_space<vmem>>, %arg3: memref<32x32xf32, #tpu.memory_space<vmem>>, %arg4: memref<1x32x256xf32, #tpu.memory_space<vmem>>) attributes {dimension_semantics = [#tpu.dimension_semantics<parallel>], iteration_bounds = array<i64: 2>, scalar_prefetch = 0 : i64, scratch_operands = 0 : i64, tpu.core_type = #tpu.core_type<tc>, window_params = [{transform_indices = @transform_0, window_bounds = array<i64: 1, 32, 256>}, {pipeline_mode = #tpu.pipeline_mode<synchronous>, transform_indices = @transform_1, window_bounds = array<i64: 96, 32>}, {pipeline_mode = #tpu.pipeline_mode<synchronous>, transform_indices = @transform_2, window_bounds = array<i64: 32, 32>}, {transform_indices = @transform_3, window_bounds = array<i64: 1, 32, 256>}]} {
    %c0 = arith.constant 0 : index
    %c0_0 = arith.constant 0 : index
    %0 = vector.load %arg2[%c0, %c0_0] : memref<96x32xf32, #tpu.memory_space<vmem>>, vector<96x32xf32>
    %c0_1 = arith.constant 0 : index
    %c0_2 = arith.constant 0 : index
    %1 = vector.load %arg3[%c0_1, %c0_2] : memref<32x32xf32, #tpu.memory_space<vmem>>, vector<32x32xf32>
    %c0_3 = arith.constant 0 : index
    %c0_4 = arith.constant 0 : index
    %c0_5 = arith.constant 0 : index
    %2 = vector.load %arg1[%c0_3, %c0_4, %c0_5] : memref<1x32x256xf32, #tpu.memory_space<vmem>>, vector<1x32x256xf32>
    %3 = vector.shape_cast %2 : vector<1x32x256xf32> to vector<32x256xf32>
    %cst = arith.constant dense<0.000000e+00> : vector<96x256xf32>
    %4 = tpu.matmul %0, %3, %cst {dimension_numbers = #tpu.dot_dimension_numbers<[1], [0], [0], [1], [0, 0, 1, 1], [], []>} : vector<96x32xf32>, vector<32x256xf32>, vector<96x256xf32> -> vector<96x256xf32>
    %5 = vector.extract_strided_slice %4 {offsets = [0, 0], sizes = [32, 256], strides = [1, 1]} : vector<96x256xf32> to vector<32x256xf32>
    %6 = vector.extract_strided_slice %4 {offsets = [32, 0], sizes = [32, 256], strides = [1, 1]} : vector<96x256xf32> to vector<32x256xf32>
    %7 = vector.extract_strided_slice %4 {offsets = [64, 0], sizes = [32, 256], strides = [1, 1]} : vector<96x256xf32> to vector<32x256xf32>
    %cst_6 = arith.constant dense<0.000000e+00> : vector<256x256xf32>
    %8 = tpu.matmul %6, %5, %cst_6 {dimension_numbers = #tpu.dot_dimension_numbers<[0], [0], [1], [1], [0, 1, 1, 1], [], []>} : vector<32x256xf32>, vector<32x256xf32>, vector<256x256xf32> -> vector<256x256xf32>
    %cst_7 = arith.constant dense<0xFF800000> : vector<256xf32>
    %9 = vector.multi_reduction <maximumf>, %8, %cst_7 [0] : vector<256x256xf32> to vector<256xf32>
    %10 = vector.shape_cast %9 : vector<256xf32> to vector<1x256xf32>
    %11 = vector.broadcast %10 : vector<1x256xf32> to vector<256x256xf32>
    %12 = arith.subf %8, %11 : vector<256x256xf32>
    %13 = math.exp %12 : vector<256x256xf32>
    %cst_8 = arith.constant dense<0.000000e+00> : vector<256xf32>
    %14 = vector.multi_reduction <add>, %13, %cst_8 [0] : vector<256x256xf32> to vector<256xf32>
    %15 = vector.shape_cast %14 : vector<256xf32> to vector<1x256xf32>
    %16 = tpu.reciprocal %15 {approx = true} : vector<1x256xf32> -> vector<1x256xf32>
    %17 = arith.mulf %15, %16 : vector<1x256xf32>
    %cst_9 = arith.constant 2.000000e+00 : f32
    %18 = vector.broadcast %cst_9 : f32 to vector<1x256xf32>
    %19 = arith.subf %18, %17 : vector<1x256xf32>
    %20 = arith.mulf %16, %19 : vector<1x256xf32>
    %cst_10 = arith.constant dense<0.000000e+00> : vector<32x256xf32>
    %21 = tpu.matmul %7, %13, %cst_10 {dimension_numbers = #tpu.dot_dimension_numbers<[1], [0], [0], [1], [0, 0, 1, 1], [], []>} : vector<32x256xf32>, vector<256x256xf32>, vector<32x256xf32> -> vector<32x256xf32>
    %22 = vector.broadcast %20 : vector<1x256xf32> to vector<32x256xf32>
    %23 = arith.mulf %21, %22 : vector<32x256xf32>
    %cst_11 = arith.constant dense<0.000000e+00> : vector<32x256xf32>
    %24 = tpu.matmul %1, %23, %cst_11 {dimension_numbers = #tpu.dot_dimension_numbers<[1], [0], [0], [1], [0, 0, 1, 1], [], []>} : vector<32x32xf32>, vector<32x256xf32>, vector<32x256xf32> -> vector<32x256xf32>
    %c0_12 = arith.constant 0 : index
    %c0_13 = arith.constant 0 : index
    %c0_14 = arith.constant 0 : index
    %25 = vector.load %arg4[%c0_12, %c0_13, %c0_14] : memref<1x32x256xf32, #tpu.memory_space<vmem>>, vector<1x32x256xf32>
    %26 = vector.shape_cast %25 : vector<1x32x256xf32> to vector<32x256xf32>
    %27 = vector.shape_cast %24 : vector<32x256xf32> to vector<1x32x256xf32>
    tpu.vector_store %arg4[%c0_12, %c0_13, %c0_14], %27 {strides = array<i32>} : memref<1x32x256xf32, #tpu.memory_space<vmem>>, vector<1x32x256xf32>,
    return
  }
  func.func @transform_0(%arg0: i32) -> (i32, i32, i32) {
    %c0_i32 = arith.constant 0 : i32
    %c0_i32_0 = arith.constant 0 : i32
    %c0_i32_1 = arith.constant 0 : i32
    return %arg0, %c0_i32, %c0_i32_0 : i32, i32, i32
  }
  func.func @transform_1(%arg0: i32) -> (i32, i32) {
    %c0_i32 = arith.constant 0 : i32
    %c0_i32_0 = arith.constant 0 : i32
    %c0_i32_1 = arith.constant 0 : i32
    return %c0_i32, %c0_i32_0 : i32, i32
  }
  func.func @transform_2(%arg0: i32) -> (i32, i32) {
    %c0_i32 = arith.constant 0 : i32
    %c0_i32_0 = arith.constant 0 : i32
    %c0_i32_1 = arith.constant 0 : i32
    return %c0_i32, %c0_i32_0 : i32, i32
  }
  func.func @transform_3(%arg0: i32) -> (i32, i32, i32) {
    %c0_i32 = arith.constant 0 : i32
    %c0_i32_0 = arith.constant 0 : i32
    %c0_i32_1 = arith.constant 0 : i32
    return %arg0, %c0_i32, %c0_i32_0 : i32, i32, i32
  }
}

</mosaic_0001>

<bundles_post_ra>
// kernel: tpu_custom_call.1
= control target key start
LH: loop header
LB: loop body
LE: loop exit
PB: predicated region body
PF: predicated region fallthrough
CT: control target
= control target key end

     0   :  { %8 = vsyncpa [#allocation3], 0  ;;  %s2544_s0 = inlined_call_operand.vmem [shape: f32[2,32,256], index: 0, kind: input, shape index: {}]   ;;  %s2545_s1 = inlined_call_operand.vmem [shape: f32[96,32], index: 1, kind: input, shape index: {}]   ;;  %s2546_s2 = inlined_call_operand.hbm [shape: f32[32,32], index: 2, kind: input, shape index: {}]   ;;  %s2547_s3 = inlined_call_operand.hbm [shape: f32[2,32,256], index: 3, kind: output, shape index: {}]  }
   0x1   :  { %9 = vsyncpa [#allocation4], 0 }
   0x2   :  { %11 = vsyncpa [#allocation4 + $0x1], 0  ;;  %s1809_s12 = smov 0   ;;  %s1811_s13 = smov 0  }
   0x3   :  { %s1813_s14 = smov 0   ;;  %s1815_s15 = smov 0  }
   0x4 LB: > { %s1830_s16 = sadd.s32 4294967295, %s1782_s15   ;;  %s1379_s17 = sadd.s32 4294967294, %s1782_s15   ;;  %s1782_s15 = sphi %s1815_s15, %s2631_s15   ;;  %s1778_s14 = sphi %s1813_s14, %s2630_s14   ;;  %s1774_s13 = sphi %s1811_s13, %s2629_s13   ;;  %s1770_s12 = sphi %s1809_s12, %s2628_s12  }
   0x5   : > { %s1834_s18 = sadd.s32 1, %s1782_s15   ;;  %s92_s19 = sadd.s32 1, %s1778_s14 }
   0x6   : > { %s89_s20 = ssub.s32 %s1782_s15, %s1834_s18  ;;  %p102_p0 = scmp.ne.s32.totalorder %s1778_s14, %s1774_s13 }
   0x7   : > { %p90_p1 = scmp.eq.s32.totalorder %s89_s20, 0  ;;  %p103_p2 = scmp.eq.s32.totalorder %s1830_s16, 1 }
   0x8   : > { %p108_p3 = scmp.ne.s32.totalorder %s1774_s13, %s1770_s12  ;;  %p109_p4 = scmp.eq.s32.totalorder %s1379_s17, 1 }
   0x9   : > { %s1845_s21 = scalar_select %p90_p1, %s1778_s14, %s92_s19  }
   0xa   : > { %p1847_p5 = por %p103_p2, %p102_p0  ;;  %p1851_p6 = por %p109_p4, %p108_p3 }
   0xb   : > { %p1380_p7 = scmp.ge.s32.totalorder %s1782_s15, 1  ;;  %p116_p8 = scmp.lt.s32.totalorder %s1782_s15, 3 }
   0xc   : > { %p1513_p9 = scmp.eq.s32.totalorder %s1830_s16, 0  ;;  %s130_s26 = sshll.u32 %s2546_s2, 4  ;;  %s131_s26 = int_to_ptr.hbm [resolvable:$true] %s130_s26 }
   0xd   : > { %p117_p10 = pnand %p1380_p7, %p116_p8  ;;  %s1784_s27 = smov [#allocation2]  }
   0xe   : > { %s132_s28 = sshll.u32 %s1784_s27, 4  ;;  %s1785_s29 = smov 128   ;;  %s133_s28 = int_to_ptr.vmem [resolvable:$true] %s132_s28 }
   0xf   : > { %p1505_p11 = pneg %p117_p10  ;;  %s1786_s30 = smov 8  }
  0x10   : > { %156 = sbr.rel (%p117_p10) target bundleno = 1173 (0x495), region = 32 }
  0x11   : > { %p1506_p12 = pnand %p1513_p9, %p1505_p11 }
  0x13   : > { %1508 = dma.hbm_to_vmem [thread:$0]  (!%p1506_p12), %s131_s26, 512, %s133_s28, [#allocation3], %s1785_s29, %s1785_s29, %s1786_s30  }
  0x15   : > { %1761 = dma.done.wait (%p1513_p9), [#allocation3], 512  }
  0x16   : > { %1763 = vsyncadd (%p1513_p9), [#allocation3], 4294966784  ;;  %p181_p13 = scmp.lt.s32.totalorder %s1830_s16, 1  ;;  %v186_v4 = vld [vmem:[%s2545_s1] sm:$0xff]  ;;  %vm210_vm0 = vcmask 261120   ;;  %v187_v5 = vld [vmem:[%s2545_s1 + $0x8] sm:$0xff] }
  0x17   : > { %v188_v6 = vld [vmem:[%s2545_s1 + $0x10] sm:$0xff]  ;;  %v189_v7 = vld [vmem:[%s2545_s1 + $0x18] sm:$0xff]  ;;  %v190_v12 = vld [vmem:[%s2545_s1 + $0x20] sm:$0xff]  ;;  %s178_s24 = sand.u32 1, %s1774_s13   ;;  %s1490_s27 = sshll.u32 %s1830_s16, 6 }
  0x18   : > { %s182_s4 = scalar_select %p181_p13, %s1830_s16, 1  ;;  %v191_v13 = vld [vmem:[%s2545_s1 + $0x28] sm:$0xff]  ;;  %v192_v14 = vld [vmem:[%s2545_s1 + $0x30] sm:$0xff]  ;;  %v193_v15 = vld [vmem:[%s2545_s1 + $0x38] sm:$0xff] }
  0x19   : > { %v194_v22 = vld [vmem:[%s2545_s1 + $0x40] sm:$0xff]  ;;  %v195_v25 = vld [vmem:[%s2545_s1 + $0x48] sm:$0xff]  ;;  %v196_v28 = vld [vmem:[%s2545_s1 + $0x50] sm:$0xff]  ;;  %s1385_s25 = sshll.u32 %s178_s24, 6  ;;  %s1301_s30 = scalar_lea.hbm %s2547_s3, %s1490_s27 }
  0x1a   : > { %s1489_s5 = sshll.u32 %s182_s4, 6  ;;  %v197_v31 = vld [vmem:[%s2545_s1 + $0x58] sm:$0xff]  ;;  %s180_s26 = scalar_lea.vmem [#allocation5], %s1385_s25 }
  0x1b   : > { %s185_s8 = scalar_lea.vmem %s2544_s0, %s1489_s5  ;;  %s1302_s4 = sshll.u32 %s180_s26, 4  ;;  %s1303_s4 = int_to_ptr.vmem [resolvable:$true] %s1302_s4 }
  0x1c   : > { %v208_v0 = vld [vmem:[%s185_s8 + $0x30] sm:$0xff]  ;;  %v206_v1 = vld [vmem:[%s185_s8 + $0x20] sm:$0xff]  ;;  %v209_v8 = vld [vmem:[%s185_s8 + $0x38] sm:$0xff]  ;;  %s1304_s5 = sshll.u32 %s1301_s30, 4  ;;  %s1290_s6 = scalar_lea.sflag [#allocation4], %s178_s24  ;;  %s1305_s5 = int_to_ptr.hbm [resolvable:$true] %s1304_s5 }
  0x1d   : > { %259 = vmatpush.msra.mxu0 %v208_v0  ;;  %v204_v2 = vld [vmem:[%s185_s8 + $0x10] sm:$0xff]  ;;  %v202_v3 = vld [vmem:[%s185_s8] sm:$0xff]  ;;  %v207_v9 = vld [vmem:[%s185_s8 + $0x28] sm:$0xff]  ;;  %312 = vmatpush.msra.mxu1 %v209_v8  ;;  %s1730_s7 = sshra.s32 %s1305_s5, 4  ;;  %s1736_s10 = scalar_lea.hbm %s2547_s3, 128  ;;  %s1731_s7 = int_to_ptr.hbm [resolvable:$true] %s1730_s7 }
  0x1e   : > { %v205_v10 = vld [vmem:[%s185_s8 + $0x18] sm:$0xff]  ;;  %v203_v11 = vld [vmem:[%s185_s8 + $0x8] sm:$0xff]  ;;  %s1732_s8 = scalar_lea.hbm %s1731_s7, 64  ;;  %p1737_p3 = scmp.lt.s32.totalorder %s1731_s7, %s2547_s3 }
  0x1f   : > { %260 = vmatpush.msra.mxu0 %v206_v1  ;;  %313 = vmatpush.msra.mxu1 %v207_v9  ;;  %p1733_p0 = scmp.ne.s32.totalorder %s1731_s7, %s1732_s8  ;;  %p1738_p4 = scmp.lt.s32.totalorder %s1736_s10, %s1732_s8 }
  0x21   : > { %261 = vmatpush.msra.mxu0 %v204_v2  ;;  %314 = vmatpush.msra.mxu1 %v205_v10  ;;  %p1734_p1 = pnand %p1733_p0, %p1847_p5  ;;  %p1739_p7 = por %p1738_p4, %p1737_p3 }
  0x23   : > { %262 = vmatpush.msra.mxu0 %v202_v3  ;;  %315 = vmatpush.msra.mxu1 %v203_v11  ;;  %p1735_p2 = pneg %p1734_p1 }
  0x24   : > { %1388 = vmatmul.msk.f32.vlgmr.msra.gmra.mxu0 %vm210_vm0, %v186_v4  ;;  %1400 = vmatmul.msk.f32.vlgmr.msra.gmra.mxu1 %vm210_vm0, %v186_v4 }
  0x25   : > { %p1740_p8 = pnand %p1739_p7, %p1735_p2 }
  0x2c   : > { %1389 = vmatmul.msk.f32.gmra.mxu0 %vm210_vm0, %v187_v5  ;;  %1401 = vmatmul.msk.f32.gmra.mxu1 %vm210_vm0, %v187_v5 }
  0x34   : > { %1390 = vmatmul.msk.f32.gmra.mxu0 %vm210_vm0, %v188_v6  ;;  %1402 = vmatmul.msk.f32.gmra.mxu1 %vm210_vm0, %v188_v6 }
  0x3c   : > { %1391 = vmatmul.msk.f32.gmra.mxu0 %vm210_vm0, %v189_v7  ;;  %1403 = vmatmul.msk.f32.gmra.mxu1 %vm210_vm0, %v189_v7 }
  0x44   : > { %1392 = vmatmul.msk.f32.gmra.mxu0 %vm210_vm0, %v190_v12  ;;  %1404 = vmatmul.msk.f32.gmra.mxu1 %vm210_vm0, %v190_v12 }
  0x4c   : > { %1393 = vmatmul.msk.f32.gmra.mxu0 %vm210_vm0, %v191_v13  ;;  %1405 = vmatmul.msk.f32.gmra.mxu1 %vm210_vm0, %v191_v13 }
  0x54   : > { %1394 = vmatmul.msk.f32.gmra.mxu0 %vm210_vm0, %v192_v14  ;;  %1406 = vmatmul.msk.f32.gmra.mxu1 %vm210_vm0, %v192_v14 }
  0x5c   : > { %1395 = vmatmul.msk.f32.gmra.mxu0 %vm210_vm0, %v193_v15  ;;  %1407 = vmatmul.msk.f32.gmra.mxu1 %vm210_vm0, %v193_v15 }
  0x64   : > { %1396 = vmatmul.msk.f32.gmra.mxu0 %vm210_vm0, %v194_v22  ;;  %1408 = vmatmul.msk.f32.gmra.mxu1 %vm210_vm0, %v194_v22 }
  0x6c   : > { %1397 = vmatmul.msk.f32.gmra.mxu0 %vm210_vm0, %v195_v25  ;;  %1409 = vmatmul.msk.f32.gmra.mxu1 %vm210_vm0, %v195_v25 }
  0x74   : > { %1398 = vmatmul.msk.f32.gmra.mxu0 %vm210_vm0, %v196_v28  ;;  %1410 = vmatmul.msk.f32.gmra.mxu1 %vm210_vm0, %v196_v28 }
  0x7c   : > { %1399 = vmatmul.msk.f32.gmra.mxu0 %vm210_vm0, %v197_v31  ;;  %1411 = vmatmul.msk.f32.gmra.mxu1 %vm210_vm0, %v197_v31 }
  0xa1   : > { %v264_v16 = vpop.f32.mrf.mxu0  ;;  %v317_v21 = vpop.f32.mrf.mxu1 }
  0xa9   : > { %v267_v17 = vpop.f32.mrf.mxu0  ;;  %v320_v24 = vpop.f32.mrf.mxu1 }
  0xb1   : > { %v270_v18 = vpop.f32.mrf.mxu0  ;;  %v323_v27 = vpop.f32.mrf.mxu1 }
  0xb9   : > { %v273_v19 = vpop.f32.mrf.mxu0  ;;  %v326_v30 = vpop.f32.mrf.mxu1 }
  0xba   : > { %525 = vmatpush.msrb.mxu0 %v273_v19  ;;  %1491 = vmatpush.msra.mxu2 %v273_v19 }
  0xbb   : > { %638 = vmatpush.msrb.mxu1 %v326_v30  ;;  %1495 = vmatpush.msra.mxu3 %v326_v30 }
  0xbc   : > { %526 = vmatpush.msrb.mxu0 %v270_v18  ;;  %1492 = vmatpush.msra.mxu2 %v270_v18 }
  0xbd   : > { %639 = vmatpush.msrb.mxu1 %v323_v27  ;;  %1496 = vmatpush.msra.mxu3 %v323_v27 }
  0xbe   : > { %527 = vmatpush.msrb.mxu0 %v267_v17  ;;  %1493 = vmatpush.msra.mxu2 %v267_v17 }
  0xbf   : > { %640 = vmatpush.msrb.mxu1 %v320_v24  ;;  %1497 = vmatpush.msra.mxu3 %v320_v24 }
  0xc0   : > { %528 = vmatpush.msrb.mxu0 %v264_v16  ;;  %1494 = vmatpush.msra.mxu2 %v264_v16 }
  0xc1   : > { %v276_v20 = vpop.f32.mrf.mxu0  ;;  %641 = vmatpush.msrb.mxu1 %v317_v21  ;;  %1498 = vmatpush.msra.mxu3 %v317_v21  ;;  %v329_v32 = vpop.f32.mrf.mxu1 }
  0xc2   : > { %353 = vxpose.xlu0.b32.start [1/4] (short) %v276_v20, 128  ;;  %385 = vxpose.xlu1.b32.start [1/4] (short) %v329_v32, 128 }
  0xc9   : > { %v279_v23 = vpop.f32.mrf.mxu0  ;;  %v332_v33 = vpop.f32.mrf.mxu1 }
  0xca   : > { %354 = vxpose.xlu0.b32.cont [2/4] (short) %v279_v23, 128  ;;  %386 = vxpose.xlu1.b32.cont [2/4] (short) %v332_v33, 128 }
  0xd1   : > { %v282_v26 = vpop.f32.mrf.mxu0  ;;  %v335_v34 = vpop.f32.mrf.mxu1 }
  0xd2   : > { %355 = vxpose.xlu0.b32.cont [3/4] (short) %v282_v26, 128  ;;  %387 = vxpose.xlu1.b32.cont [3/4] (short) %v335_v34, 128 }
  0xd9   : > { %v285_v29 = vpop.f32.mrf.mxu0  ;;  %v338_v35 = vpop.f32.mrf.mxu1 }
  0xda   : > { %356 = vxpose.xlu0.b32.end [4/4] (short) %v285_v29, 128  ;;  %388 = vxpose.xlu1.b32.end [4/4] (short) %v338_v35, 128 }
  0xe1   : > { %v2056_v34 = vpop.f32.mrf.mxu0 }
  0xe2   : > { %2586 = vst [vmem:[#allocation18_spill] sm:$0xff] %v2056_v34 }
 0x166   : > { %v369_v36 = vpop.trf.xlu0  ;;  %v401_v48 = vpop.trf.xlu1 }
 0x167   : > { %1412 = vmatmul.msk.f32.vlgmr.msrb.gmra.mxu0 %vm210_vm0, %v369_v36  ;;  %1444 = vmatmul.msk.f32.vlgmr.msrb.gmra.mxu1 %vm210_vm0, %v369_v36 }
 0x16e   : > { %v370_v37 = vpop.trf.xlu0  ;;  %v402_v51 = vpop.trf.xlu1 }
 0x16f   : > { %1413 = vmatmul.msk.f32.gmra.mxu0 %vm210_vm0, %v370_v37  ;;  %1445 = vmatmul.msk.f32.gmra.mxu1 %vm210_vm0, %v370_v37  ;;  %v2062_v37 = vpop.f32.mrf.mxu0 }
 0x170   : > { %2588 = vst [vmem:[#allocation20_spill] sm:$0xff] %v2062_v37 }
 0x176   : > { %v371_v38 = vpop.trf.xlu0  ;;  %v403_v53 = vpop.trf.xlu1 }
 0x177   : > { %1414 = vmatmul.msk.f32.gmra.mxu0 %vm210_vm0, %v371_v38  ;;  %1446 = vmatmul.msk.f32.gmra.mxu1 %vm210_vm0, %v371_v38 }
 0x17e   : > { %v372_v39 = vpop.trf.xlu0  ;;  %v404_v55 = vpop.trf.xlu1 }
 0x17f   : > { %1415 = vmatmul.msk.f32.gmra.mxu0 %vm210_vm0, %v372_v39  ;;  %1447 = vmatmul.msk.f32.gmra.mxu1 %vm210_vm0, %v372_v39 }
 0x186   : > { %v373_v40 = vpop.trf.xlu0  ;;  %v405_v56 = vpop.trf.xlu1 }
 0x187   : > { %1416 = vmatmul.msk.f32.vlgmr.msra.gmra.mxu2 %vm210_vm0, %v373_v40  ;;  %1448 = vmatmul.msk.f32.vlgmr.msra.gmra.mxu3 %vm210_vm0, %v373_v40  ;;  %v2068_v40 = vpop.f32.mrf.mxu1 }
 0x188   : > { %2589 = vst [vmem:[#allocation21_spill] sm:$0xff] %v2068_v40 }
 0x18e   : > { %v374_v41 = vpop.trf.xlu0  ;;  %v406_v57 = vpop.trf.xlu1 }
 0x18f   : > { %1417 = vmatmul.msk.f32.gmra.mxu2 %vm210_vm0, %v374_v41  ;;  %1449 = vmatmul.msk.f32.gmra.mxu3 %vm210_vm0, %v374_v41  ;;  %v2070_v41 = vpop.f32.mrf.mxu0 }
 0x190   : > { %2590 = vst [vmem:[#allocation22_spill] sm:$0xff] %v2070_v41 }
 0x196   : > { %v375_v42 = vpop.trf.xlu0  ;;  %v407_v58 = vpop.trf.xlu1 }
 0x197   : > { %1418 = vmatmul.msk.f32.gmra.mxu2 %vm210_vm0, %v375_v42  ;;  %1450 = vmatmul.msk.f32.gmra.mxu3 %vm210_vm0, %v375_v42 }
 0x19e   : > { %v376_v43 = vpop.trf.xlu0  ;;  %v408_v61 = vpop.trf.xlu1 }
 0x19f   : > { %1419 = vmatmul.msk.f32.gmra.mxu2 %vm210_vm0, %v376_v43  ;;  %1451 = vmatmul.msk.f32.gmra.mxu3 %vm210_vm0, %v376_v43 }
 0x1a6   : > { %v377_v44 = vpop.trf.xlu0  ;;  %v409_v0 = vpop.trf.xlu1 }
 0x1a7   : > { %1420 = vmatmul.msk.f32.gmra.mxu2 %vm210_vm0, %v377_v44  ;;  %1452 = vmatmul.msk.f32.gmra.mxu3 %vm210_vm0, %v377_v44  ;;  %v2076_v44 = vpop.f32.mrf.mxu1 }
 0x1a8   : > { %2591 = vst [vmem:[#allocation23_spill] sm:$0xff] %v2076_v44 }
 0x1ae   : > { %v378_v45 = vpop.trf.xlu0  ;;  %v410_v3 = vpop.trf.xlu1 }
 0x1af   : > { %1421 = vmatmul.msk.f32.gmra.mxu2 %vm210_vm0, %v378_v45  ;;  %1453 = vmatmul.msk.f32.gmra.mxu3 %vm210_vm0, %v378_v45 }
 0x1b6   : > { %v379_v46 = vpop.trf.xlu0  ;;  %v411_v6 = vpop.trf.xlu1 }
 0x1b7   : > { %1422 = vmatmul.msk.f32.gmra.mxu2 %vm210_vm0, %v379_v46  ;;  %1454 = vmatmul.msk.f32.gmra.mxu3 %vm210_vm0, %v379_v46 }
 0x1be   : > { %v380_v47 = vpop.trf.xlu0  ;;  %v412_v11 = vpop.trf.xlu1 }
 0x1bf   : > { %1423 = vmatmul.msk.f32.gmra.mxu2 %vm210_vm0, %v380_v47  ;;  %1455 = vmatmul.msk.f32.gmra.mxu3 %vm210_vm0, %v380_v47  ;;  %v2082_v47 = vpop.f32.mrf.mxu0 }
 0x1c0   : > { %2592 = vst [vmem:[#allocation24_spill] sm:$0xff] %v2082_v47 }
 0x1c6   : > { %v381_v49 = vpop.trf.xlu0  ;;  %v413_v14 = vpop.trf.xlu1 }
 0x1c7   : > { %1424 = vmatmul.msk.f32.gmra.mxu2 %vm210_vm0, %v381_v49  ;;  %1456 = vmatmul.msk.f32.gmra.mxu3 %vm210_vm0, %v381_v49 }
 0x1ce   : > { %v382_v50 = vpop.trf.xlu0  ;;  %v414_v17 = vpop.trf.xlu1 }
 0x1cf   : > { %1425 = vmatmul.msk.f32.gmra.mxu2 %vm210_vm0, %v382_v50  ;;  %1457 = vmatmul.msk.f32.gmra.mxu3 %vm210_vm0, %v382_v50  ;;  %v2088_v50 = vpop.f32.mrf.mxu1 }
 0x1d0   : > { %2594 = vst [vmem:[#allocation26_spill] sm:$0xff] %v2088_v50 }
 0x1d6   : > { %v383_v52 = vpop.trf.xlu0  ;;  %v415_v20 = vpop.trf.xlu1 }
 0x1d7   : > { %1426 = vmatmul.msk.f32.gmra.mxu2 %vm210_vm0, %v383_v52  ;;  %1458 = vmatmul.msk.f32.gmra.mxu3 %vm210_vm0, %v383_v52 }
 0x1de   : > { %v384_v54 = vpop.trf.xlu0  ;;  %v416_v25 = vpop.trf.xlu1 }
 0x1df   : > { %1427 = vmatmul.msk.f32.gmra.mxu2 %vm210_vm0, %v384_v54  ;;  %1459 = vmatmul.msk.f32.gmra.mxu3 %vm210_vm0, %v384_v54  ;;  %v2096_v54 = vpop.f32.mrf.mxu1 }
 0x1e0   : > { %2596 = vst [vmem:[#allocation28_spill] sm:$0xff] %v2096_v54 }
 0x1e7   : > { %1428 = vmatmul.msk.f32.gmra.mxu2 %vm210_vm0, %v401_v48  ;;  %1460 = vmatmul.msk.f32.gmra.mxu3 %vm210_vm0, %v401_v48 }
 0x1ef   : > { %1429 = vmatmul.msk.f32.gmra.mxu2 %vm210_vm0, %v402_v51  ;;  %1461 = vmatmul.msk.f32.gmra.mxu3 %vm210_vm0, %v402_v51  ;;  %v2090_v51 = vpop.f32.mrf.mxu0 }
 0x1f7   : > { %1430 = vmatmul.msk.f32.gmra.mxu2 %vm210_vm0, %v403_v53  ;;  %1462 = vmatmul.msk.f32.gmra.mxu3 %vm210_vm0, %v403_v53 }
 0x1ff   : > { %1431 = vmatmul.msk.f32.gmra.mxu2 %vm210_vm0, %v404_v55  ;;  %1463 = vmatmul.msk.f32.gmra.mxu3 %vm210_vm0, %v404_v55  ;;  %v2098_v55 = vpop.f32.mrf.mxu0 }
 0x207   : > { %1432 = vmatmul.msk.f32.gmra.mxu2 %vm210_vm0, %v405_v56  ;;  %1464 = vmatmul.msk.f32.gmra.mxu3 %vm210_vm0, %v405_v56 }
 0x20a   : > { %v1974_v59 = vpop.f32.mrf.mxu2  ;;  %v1976_v60 = vpop.f32.mrf.mxu3 }
 0x20b   : > { %2576 = vst [vmem:[#allocation8_spill] sm:$0xff] %v1974_v59 }
 0x20f   : > { %1433 = vmatmul.msk.f32.gmra.mxu2 %vm210_vm0, %v406_v57  ;;  %1465 = vmatmul.msk.f32.gmra.mxu3 %vm210_vm0, %v406_v57 }
 0x212   : > { %v1980_v62 = vpop.f32.mrf.mxu2  ;;  %v1982_v63 = vpop.f32.mrf.mxu3 }
 0x213   : > { %2577 = vst [vmem:[#allocation9_spill] sm:$0xff] %v1980_v62 }
 0x217   : > { %1434 = vmatmul.msk.f32.gmra.mxu2 %vm210_vm0, %v407_v58  ;;  %1466 = vmatmul.msk.f32.gmra.mxu3 %vm210_vm0, %v407_v58  ;;  %v2104_v58 = vpop.f32.mrf.mxu1 }
 0x21a   : > { %v1986_v1 = vpop.f32.mrf.mxu2  ;;  %v1988_v2 = vpop.f32.mrf.mxu3 }
 0x21f   : > { %1435 = vmatmul.msk.f32.gmra.mxu2 %vm210_vm0, %v408_v61  ;;  %1467 = vmatmul.msk.f32.gmra.mxu3 %vm210_vm0, %v408_v61  ;;  %v2106_v61 = vpop.f32.mrf.mxu0 }
 0x222   : > { %v1992_v4 = vpop.f32.mrf.mxu2  ;;  %v1994_v5 = vpop.f32.mrf.mxu3 }
 0x223   : > { %2578 = vst [vmem:[#allocation10_spill] sm:$0xff] %v1992_v4 }
 0x224   : > { %2579 = vst [vmem:[#allocation11_spill] sm:$0xff] %v1994_v5 }
 0x227   : > { %1436 = vmatmul.msk.f32.gmra.mxu2 %vm210_vm0, %v409_v0  ;;  %1468 = vmatmul.msk.f32.gmra.mxu3 %vm210_vm0, %v409_v0 }
 0x22a   : > { %v1998_v7 = vpop.f32.mrf.mxu2  ;;  %v2000_v8 = vpop.f32.mrf.mxu3 }
 0x22f   : > { %1437 = vmatmul.msk.f32.gmra.mxu2 %vm210_vm0, %v410_v3  ;;  %1469 = vmatmul.msk.f32.gmra.mxu3 %vm210_vm0, %v410_v3 }
 0x232   : > { %v2004_v9 = vpop.f32.mrf.mxu2  ;;  %v2006_v10 = vpop.f32.mrf.mxu3 }
 0x233   : > { %2580 = vst [vmem:[#allocation12_spill] sm:$0xff] %v2004_v9 }
 0x234   : > { %2581 = vst [vmem:[#allocation13_spill] sm:$0xff] %v2006_v10 }
 0x237   : > { %1438 = vmatmul.msk.f32.gmra.mxu2 %vm210_vm0, %v411_v6  ;;  %1470 = vmatmul.msk.f32.gmra.mxu3 %vm210_vm0, %v411_v6  ;;  %v2112_v6 = vpop.f32.mrf.mxu1 }
 0x238   : > { %2598 = vst [vmem:[#allocation30_spill] sm:$0xff] %v2112_v6 }
 0x23a   : > { %v2010_v12 = vpop.f32.mrf.mxu2  ;;  %v2012_v13 = vpop.f32.mrf.mxu3 }
 0x23f   : > { %1439 = vmatmul.msk.f32.gmra.mxu2 %vm210_vm0, %v412_v11  ;;  %1471 = vmatmul.msk.f32.gmra.mxu3 %vm210_vm0, %v412_v11  ;;  %v2130_v40 = vpop.f32.mrf.mxu1 }
 0x240   : > { %2600 = vst [vmem:[#allocation32_spill] sm:$0xff] %v2130_v40 }
 0x242   : > { %v2016_v15 = vpop.f32.mrf.mxu2  ;;  %v2018_v16 = vpop.f32.mrf.mxu3 }
 0x243   : > { %2582 = vst [vmem:[#allocation14_spill] sm:$0xff] %v2018_v16 }
 0x247   : > { %1440 = vmatmul.msk.f32.gmra.mxu2 %vm210_vm0, %v413_v14  ;;  %1472 = vmatmul.msk.f32.gmra.mxu3 %vm210_vm0, %v413_v14  ;;  %v2116_v14 = vpop.f32.mrf.mxu0 }
 0x248   : > { %2599 = vst [vmem:[#allocation31_spill] sm:$0xff] %v2116_v14 }
 0x24a   : > { %v2022_v18 = vpop.f32.mrf.mxu2  ;;  %v2024_v19 = vpop.f32.mrf.mxu3 }
 0x24f   : > { %1441 = vmatmul.msk.f32.gmra.mxu2 %vm210_vm0, %v414_v17  ;;  %1473 = vmatmul.msk.f32.gmra.mxu3 %vm210_vm0, %v414_v17  ;;  %v739_v17 = vmax.f32 %v2090_v51, %v2106_v61 }
 0x252   : > { %v2028_v21 = vpop.f32.mrf.mxu2  ;;  %v2030_v22 = vpop.f32.mrf.mxu3 }
 0x253   : > { %2583 = vst [vmem:[#allocation15_spill] sm:$0xff] %v2030_v22 }
 0x257   : > { %1442 = vmatmul.msk.f32.gmra.mxu2 %vm210_vm0, %v415_v20  ;;  %1474 = vmatmul.msk.f32.gmra.mxu3 %vm210_vm0, %v415_v20  ;;  %v740_v20 = vmax.f32 %v2098_v55, %v2116_v14 }
 0x259   : > { %v742_v54 = vmax.f32 %v740_v20, %v1980_v62 }
 0x25a   : > { %v2034_v23 = vpop.f32.mrf.mxu2  ;;  %v2036_v24 = vpop.f32.mrf.mxu3 }
 0x25b   : > { %v744_v41 = vmax.f32 %v742_v54, %v1992_v4 }
 0x25d   : > { %v746_v34 = vmax.f32 %v744_v41, %v2004_v9  ;;  %v2146_v9 = vpop.f32.mrf.mxu1 }
 0x25e   : > { %2601 = vst [vmem:[#allocation33_spill] sm:$0xff] %v2146_v9 }
 0x25f   : > { %1443 = vmatmul.msk.f32.gmra.mxu2 %vm210_vm0, %v416_v25  ;;  %1475 = vmatmul.msk.f32.gmra.mxu3 %vm210_vm0, %v416_v25  ;;  %v741_v25 = vmax.f32 %v739_v17, %v1974_v59  ;;  %v748_v17 = vmax.f32 %v746_v34, %v2016_v15 }
 0x261   : > { %v743_v44 = vmax.f32 %v741_v25, %v1986_v1  ;;  %v750_v62 = vmax.f32 %v748_v17, %v2028_v21 }
 0x262   : > { %v2040_v26 = vpop.f32.mrf.mxu2  ;;  %v2042_v27 = vpop.f32.mrf.mxu3 }
 0x263   : > { %v745_v37 = vmax.f32 %v743_v44, %v1998_v7  ;;  %v752_v54 = vmax.f32 %v750_v62, %v2040_v26 }
 0x265   : > { %v747_v14 = vmax.f32 %v745_v37, %v2010_v12 }
 0x267   : > { %v749_v20 = vmax.f32 %v747_v14, %v2022_v18  ;;  %v777_v14 = vmax.f32 %v2112_v6, %v2146_v9 }
 0x269   : > { %v751_v25 = vmax.f32 %v749_v20, %v2034_v23 }
 0x26a   : > { %v2044_v28 = vpop.f32.mrf.mxu2  ;;  %v2046_v29 = vpop.f32.mrf.mxu3 }
 0x26b   : > { %v753_v44 = vmax.f32 %v751_v25, %v2044_v28  ;;  %v776_v25 = vmax.f32 %v2104_v58, %v2130_v40 }
 0x272   : > { %v2048_v30 = vpop.f32.mrf.mxu2  ;;  %v2050_v31 = vpop.f32.mrf.mxu3 }
 0x273   : > { %2584 = vst [vmem:[#allocation16_spill] sm:$0xff] %v2048_v30  ;;  %v754_v41 = vmax.f32 %v752_v54, %v2048_v30  ;;  %v779_v54 = vmax.f32 %v777_v14, %v1982_v63 }
 0x274   : > { %2585 = vst [vmem:[#allocation17_spill] sm:$0xff] %v2050_v31 }
 0x27a   : > { %v2052_v32 = vpop.f32.mrf.mxu2  ;;  %v2054_v33 = vpop.f32.mrf.mxu3 }
 0x27b   : > { %v755_v34 = vmax.f32 %v753_v44, %v2052_v32 }
 0x282   : > { %v2058_v35 = vpop.f32.mrf.mxu2  ;;  %v2060_v36 = vpop.f32.mrf.mxu3 }
 0x283   : > { %2587 = vst [vmem:[#allocation19_spill] sm:$0xff] %v2058_v35  ;;  %v756_v37 = vmax.f32 %v754_v41, %v2058_v35  ;;  %v778_v41 = vmax.f32 %v776_v25, %v1976_v60  ;;  %v781_v35 = vmax.f32 %v779_v54, %v1994_v5 }
 0x285   : > { %v780_v6 = vmax.f32 %v778_v41, %v1988_v2  ;;  %v783_v40 = vmax.f32 %v781_v35, %v2006_v10 }
 0x287   : > { %v785_v25 = vmax.f32 %v783_v40, %v2018_v16 }
 0x289   : > { %v787_v41 = vmax.f32 %v785_v25, %v2030_v22 }
 0x28a   : > { %v2064_v38 = vpop.f32.mrf.mxu2  ;;  %v2066_v39 = vpop.f32.mrf.mxu3 }
 0x28b   : > { %v757_v17 = vmax.f32 %v755_v34, %v2064_v38 }
 0x292   : > { %v2072_v42 = vpop.f32.mrf.mxu2  ;;  %v2074_v43 = vpop.f32.mrf.mxu3 }
 0x293   : > { %v758_v20 = vmax.f32 %v756_v37, %v2072_v42 }
 0x29a   : > { %v2078_v45 = vpop.f32.mrf.mxu2  ;;  %v2080_v46 = vpop.f32.mrf.mxu3 }
 0x29b   : > { %v759_v30 = vmax.f32 %v757_v17, %v2078_v45 }
 0x2a2   : > { %v2084_v48 = vpop.f32.mrf.mxu2  ;;  %v2086_v49 = vpop.f32.mrf.mxu3 }
 0x2a3   : > { %2593 = vst [vmem:[#allocation25_spill] sm:$0xff] %v2086_v49  ;;  %v760_v44 = vmax.f32 %v758_v20, %v2084_v48  ;;  %v782_v20 = vmax.f32 %v780_v6, %v2000_v8  ;;  %v789_v6 = vmax.f32 %v787_v41, %v2042_v27 }
 0x2aa   : > { %v2092_v52 = vpop.f32.mrf.mxu2  ;;  %v2094_v53 = vpop.f32.mrf.mxu3 }
 0x2ab   : > { %2595 = vst [vmem:[#allocation27_spill] sm:$0xff] %v2094_v53  ;;  %v761_v9 = vmax.f32 %v759_v30, %v2092_v52 }
 0x2b2   : > { %v2100_v56 = vpop.f32.mrf.mxu2  ;;  %v2102_v57 = vpop.f32.mrf.mxu3 }
 0x2b3   : > { %2597 = vst [vmem:[#allocation29_spill] sm:$0xff] %v2102_v57  ;;  %v762_v34 = vmax.f32 %v760_v44, %v2100_v56  ;;  %v784_v44 = vmax.f32 %v782_v20, %v2012_v13 }
 0x2ba   : > { %v2108_v0 = vpop.f32.mrf.mxu2  ;;  %v2110_v3 = vpop.f32.mrf.mxu3 }
 0x2bb   : > { %v763_v14 = vmax.f32 %v761_v9, %v2108_v0 }
 0x2c2   : > { %v2114_v11 = vpop.f32.mrf.mxu2  ;;  %v2124_v50 = vpop.f32.mrf.mxu3 }
 0x2c3   : > { %v764_v17 = vmax.f32 %v762_v34, %v2114_v11  ;;  %v786_v34 = vmax.f32 %v784_v44, %v2024_v19 }
 0x2c5   : > { %v788_v40 = vmax.f32 %v786_v34, %v2036_v24 }
 0x2c7   : > { %v790_v20 = vmax.f32 %v788_v40, %v2046_v29 }
 0x2ca   : > { %v2126_v47 = vpop.f32.mrf.mxu2  ;;  %v2142_v4 = vpop.f32.mrf.mxu3 }
 0x2cb   : > { %v765_v54 = vmax.f32 %v763_v14, %v2126_v47  ;;  %v791_v14 = vmax.f32 %v789_v6, %v2050_v31 }
 0x2cd   : > { %v793_v25 = vmax.f32 %v791_v14, %v2060_v36 }
 0x2d2   : > { %v2138_v59 = vpop.f32.mrf.mxu2  ;;  %v2165_v37 = vpop.f32.mrf.mxu3 }
 0x2d3   : > { %v766_v30 = vmax.f32 %v764_v17, %v2138_v59 }
 0x2da   : > { %v2154_v62 = vpop.f32.mrf.mxu2  ;;  %v2185_v16 = vpop.f32.mrf.mxu3 }
 0x2db   : > { %v767_v35 = vmax.f32 %v765_v54, %v2154_v62  ;;  %v792_v54 = vmax.f32 %v790_v20, %v2054_v33 }
 0x2dd   : > { %v794_v41 = vmax.f32 %v792_v54, %v2066_v39 }
 0x2df   : > { %v796_v34 = vmax.f32 %v794_v41, %v2080_v46 }
 0x2e1   : > { %v798_v40 = vmax.f32 %v796_v34, %v2094_v53 }
 0x2e2   : > { %v2175_v5 = vpop.f32.mrf.mxu2 }
 0x2e3   : > { %v768_v9 = vmax.f32 %v766_v30, %v2175_v5  ;;  %v795_v30 = vmax.f32 %v793_v25, %v2074_v43 }
 0x2e5   : > { %v769_v10 = vmax.f32 %v767_v35, %v768_v9  ;;  %v797_v35 = vmax.f32 %v795_v30, %v2086_v49 }
 0x2e7   : > { %v770_v17 = vrot.slane %v769_v10, 4  ;;  %v799_v6 = vmax.f32 %v797_v35, %v2102_v57 }
 0x2e9   : > { %v771_v22 = vmax.f32 %v769_v10, %v770_v17  ;;  %v801_v14 = vmax.f32 %v799_v6, %v2124_v50  ;;  %v2197_v10 = vpop.f32.mrf.mxu3  ;;  %v800_v17 = vmax.f32 %v798_v40, %v2110_v3  ;;  %v2602_v6 = vld [vmem:[#allocation31_spill] sm:$0xff] }
 0x2eb   : > { %v772_v44 = vrot.slane %v771_v22, 2  ;;  %v803_v20 = vmax.f32 %v801_v14, %v2165_v37  ;;  %v802_v54 = vmax.f32 %v800_v17, %v2142_v4  ;;  %v2603_v14 = vld [vmem:[#allocation8_spill] sm:$0xff] }
 0x2ed   : > { %v773_v9 = vmax.f32 %v771_v22, %v772_v44  ;;  %v805_v22 = vmax.f32 %v803_v20, %v2197_v10  ;;  %v804_v30 = vmax.f32 %v802_v54, %v2185_v16 }
 0x2ef   : > { %v774_v31 = vrot.slane %v773_v9, 1  ;;  %v806_v34 = vmax.f32 %v804_v30, %v805_v22 }
 0x2f1   : > { %v2201_v25 = vmax.f32 %v773_v9, %v774_v31  ;;  %v807_v54 = vrot.slane %v806_v34, 4 }
 0x2f3   : > { %v813_v44 = vsub.f32 %v2090_v51, %v2201_v25  ;;  %v815_v41 = vsub.f32 %v2098_v55, %v2201_v25  ;;  %v817_v35 = vsub.f32 %v2106_v61, %v2201_v25  ;;  %v819_v31 = vsub.f32 %v2602_v6, %v2201_v25  ;;  %v2604_v51 = vld [vmem:[#allocation9_spill] sm:$0xff] }
 0x2f4   : > { %v821_v17 = vsub.f32 %v2603_v14, %v2201_v25  ;;  %v823_v53 = vsub.f32 %v2604_v51, %v2201_v25  ;;  %v825_v61 = vsub.f32 %v1986_v1, %v2201_v25  ;;  %v808_v30 = vmax.f32 %v806_v34, %v807_v54 }
 0x2f5   : > { %v877_v9 = vmul.f32 1.442695, %v813_v44  ;;  %v881_v40 = vmul.f32 1.442695, %v815_v41  ;;  %v885_v20 = vmul.f32 1.442695, %v817_v35  ;;  %v829_v35 = vsub.f32 %v1998_v7, %v2201_v25 }
 0x2f6   : > { %v889_v55 = vmul.f32 1.442695, %v819_v31  ;;  %v893_v22 = vmul.f32 1.442695, %v821_v17  ;;  %v2605_v44 = vld [vmem:[#allocation10_spill] sm:$0xff]  ;;  %v843_v31 = vsub.f32 %v2040_v26, %v2201_v25  ;;  %v841_v54 = vsub.f32 %v2034_v23, %v2201_v25 }
 0x2f7   : > { %1554 = vpow2.f32 %v877_v9  ;;  %v827_v41 = vsub.f32 %v2605_v44, %v2201_v25  ;;  %v897_v6 = vmul.f32 1.442695, %v823_v53  ;;  %v901_v1 = vmul.f32 1.442695, %v825_v61 }
 0x2f8   : > { %1556 = vpow2.f32 %v881_v40  ;;  %v2606_v40 = vld [vmem:[#allocation12_spill] sm:$0xff]  ;;  %v833_v51 = vsub.f32 %v2010_v12, %v2201_v25  ;;  %v909_v26 = vmul.f32 1.442695, %v829_v35  ;;  %v937_v44 = vmul.f32 1.442695, %v843_v31 }
 0x2f9   : > { %1558 = vpow2.f32 %v885_v20  ;;  %v831_v34 = vsub.f32 %v2606_v40, %v2201_v25  ;;  %v809_v20 = vrot.slane %v808_v30, 2  ;;  %v905_v7 = vmul.f32 1.442695, %v827_v41 }
 0x2fa   : > { %1560 = vpow2.f32 %v889_v55  ;;  %v835_v40 = vsub.f32 %v2016_v15, %v2201_v25  ;;  %v837_v12 = vsub.f32 %v2022_v18, %v2201_v25  ;;  %v933_v35 = vmul.f32 1.442695, %v841_v54  ;;  %v2607_v15 = vld [vmem:[#allocation16_spill] sm:$0xff] }
 0x2fb   : > { %1562 = vpow2.f32 %v893_v22  ;;  %v839_v22 = vsub.f32 %v2028_v21, %v2201_v25  ;;  %v913_v57 = vmul.f32 1.442695, %v831_v34  ;;  %v810_v41 = vmax.f32 %v808_v30, %v809_v20 }
 0x2fc   : > { %1564 = vpow2.f32 %v897_v6  ;;  %v917_v21 = vmul.f32 1.442695, %v833_v51  ;;  %v847_v34 = vsub.f32 %v2607_v15, %v2201_v25  ;;  %v849_v30 = vsub.f32 %v2052_v32, %v2201_v25  ;;  %v2608_v51 = vld [vmem:[#allocation19_spill] sm:$0xff] }
 0x2fd   : > { %v2222_v14 = vpop.eup %1554  ;;  %1566 = vpow2.f32 %v901_v1  ;;  %v929_v20 = vmul.f32 1.442695, %v839_v22  ;;  %v921_v18 = vmul.f32 1.442695, %v835_v40 }
 0x2fe   : > { %v2226_v9 = vpop.eup %1556  ;;  %1568 = vpow2.f32 %v905_v7  ;;  %v811_v7 = vrot.slane %v810_v41, 1  ;;  %v945_v40 = vmul.f32 1.442695, %v847_v34 }
 0x2ff   : > { %v1005_v17 = vadd.f32 %v2226_v9, %v2222_v14  ;;  %v2234_v53 = vpop.eup %1558  ;;  %1570 = vpow2.f32 %v909_v26  ;;  %v851_v26 = vsub.f32 %v2608_v51, %v2201_v25 }
 0x300   : > { %v2241_v61 = vpop.eup %1560  ;;  %1572 = vpow2.f32 %v937_v44  ;;  %v857_v44 = vsub.f32 %v2078_v45, %v2201_v25  ;;  %v873_v45 = vsub.f32 %v2154_v62, %v2201_v25 }
 0x301   : > { %v1006_v55 = vadd.f32 %v2234_v53, %v1005_v17  ;;  %v2248_v6 = vpop.eup %1562  ;;  %v845_v17 = vsub.f32 %v2044_v28, %v2201_v25  ;;  %1574 = vpow2.f32 %v913_v57  ;;  %v855_v57 = vsub.f32 %v2072_v42, %v2201_v25 }
 0x302   : > { %v2255_v1 = vpop.eup %1564  ;;  %1576 = vpow2.f32 %v933_v35  ;;  %v2278_v35 = vmax.f32 %v810_v41, %v811_v7  ;;  %v953_v42 = vmul.f32 1.442695, %v851_v26  ;;  %v965_v7 = vmul.f32 1.442695, %v857_v44 }
 0x303   : > { %v1007_v23 = vadd.f32 %v2241_v61, %v1006_v55  ;;  %v2262_v28 = vpop.eup %1566  ;;  %v925_v55 = vmul.f32 1.442695, %v837_v12  ;;  %1578 = vpow2.f32 %v917_v21  ;;  %v941_v15 = vmul.f32 1.442695, %v845_v17 }
 0x304   : > { %v2269_v22 = vpop.eup %1568  ;;  %1580 = vpow2.f32 %v929_v20  ;;  %v949_v12 = vmul.f32 1.442695, %v849_v30  ;;  %v859_v21 = vsub.f32 %v2084_v48, %v2201_v25  ;;  %v875_v20 = vsub.f32 %v2175_v5, %v2201_v25 }
 0x305   : > { %v1008_v31 = vadd.f32 %v2248_v6, %v1007_v23  ;;  %v853_v23 = vsub.f32 %v2064_v38, %v2201_v25  ;;  %1582 = vpow2.f32 %v921_v18  ;;  %v961_v18 = vmul.f32 1.442695, %v855_v57 }
 0x306   : > { %1584 = vpow2.f32 %v925_v55  ;;  %v814_v62 = vsub.f32 %v2104_v58, %v2278_v35  ;;  %v969_v55 = vmul.f32 1.442695, %v859_v21  ;;  %v871_v5 = vsub.f32 %v2138_v59, %v2201_v25  ;;  %v2610_v58 = vld [vmem:[#allocation32_spill] sm:$0xff] }
 0x307   : > { %v1009_v54 = vadd.f32 %v2255_v1, %v1008_v31  ;;  %v2275_v31 = vpop.eup %1570  ;;  %1586 = vpow2.f32 %v941_v15  ;;  %v957_v34 = vmul.f32 1.442695, %v853_v23  ;;  %v2609_v23 = vld [vmem:[#allocation30_spill] sm:$0xff]  ;;  %v997_v57 = vmul.f32 1.442695, %v873_v45  ;;  %v2611_v45 = vld [vmem:[#allocation33_spill] sm:$0xff] }
 0x308   : > { %v2280_v17 = vpop.eup %1572  ;;  %1588 = vpow2.f32 %v945_v40  ;;  %v816_v15 = vsub.f32 %v2609_v23, %v2278_v35  ;;  %v869_v21 = vsub.f32 %v2126_v47, %v2201_v25  ;;  %v879_v23 = vmul.f32 1.442695, %v814_v62 }
 0x309   : > { %v1010_v32 = vadd.f32 %v2262_v28, %v1009_v54  ;;  %v2284_v54 = vpop.eup %1574  ;;  %1087 = vmatpush.msra.mxu0 %v2280_v17  ;;  %1590 = vpow2.f32 %v949_v12  ;;  %v1001_v12 = vmul.f32 1.442695, %v875_v20 }
 0x30a   : > { %v1577_v41 = vpop.eup %1576  ;;  %1592 = vpow2.f32 %v953_v42 }
 0x30b   : > { %v1011_v38 = vadd.f32 %v2269_v22, %v1010_v32  ;;  %v1579_v48 = vpop.eup %1578  ;;  %1088 = vmatpush.msra.mxu0 %v1577_v41  ;;  %1594 = vpow2.f32 %v957_v34  ;;  %v820_v34 = vsub.f32 %v2611_v45, %v2278_v35 }
 0x30c   : > { %v1581_v26 = vpop.eup %1580  ;;  %1596 = vpow2.f32 %v961_v18  ;;  %v883_v18 = vmul.f32 1.442695, %v816_v15  ;;  %v865_v15 = vsub.f32 %v2108_v0, %v2201_v25  ;;  %v861_v0 = vsub.f32 %v2092_v52, %v2201_v25 }
 0x30d   : > { %v1012_v30 = vadd.f32 %v2275_v31, %v1011_v38  ;;  %v1583_v32 = vpop.eup %1582  ;;  %1089 = vmatpush.msra.mxu0 %v1581_v26  ;;  %v818_v38 = vsub.f32 %v2610_v58, %v2278_v35  ;;  %1598 = vpow2.f32 %v965_v7  ;;  %v993_v58 = vmul.f32 1.442695, %v871_v5 }
 0x30e   : > { %v1585_v44 = vpop.eup %1584  ;;  %1600 = vpow2.f32 %v969_v55  ;;  %v822_v7 = vsub.f32 %v1976_v60, %v2278_v35  ;;  %v891_v5 = vmul.f32 1.442695, %v820_v34  ;;  %v863_v60 = vsub.f32 %v2100_v56, %v2201_v25 }
 0x30f   : > { %v1013_v51 = vadd.f32 %v2284_v54, %v1012_v30  ;;  %v2301_v30 = vpop.eup %1586  ;;  %1090 = vmatpush.msra.mxu0 %v1585_v44  ;;  %1602 = vpow2.f32 %v997_v57  ;;  %v887_v62 = vmul.f32 1.442695, %v818_v38  ;;  %v981_v38 = vmul.f32 1.442695, %v865_v15 }
 0x310   : > { %v2305_v59 = vpop.eup %1588  ;;  %1604 = vpow2.f32 %v1001_v12  ;;  %v844_v34 = vsub.f32 %v2042_v27, %v2278_v35  ;;  %v834_v27 = vsub.f32 %v2012_v13, %v2278_v35  ;;  %v842_v15 = vsub.f32 %v2036_v24, %v2278_v35  ;;  %v2614_v13 = vld [vmem:[#allocation14_spill] sm:$0xff]  ;;  %v2615_v24 = vld [vmem:[#allocation15_spill] sm:$0xff] }
 0x311   : > { %v1014_v40 = vadd.f32 %v1579_v48, %v1013_v51  ;;  %v2309_v20 = vpop.eup %1590  ;;  %v867_v51 = vsub.f32 %v2114_v11, %v2201_v25  ;;  %1091 = vmatpush.msra.mxu0 %v1583_v32  ;;  %1606 = vpow2.f32 %v879_v23  ;;  %v830_v23 = vsub.f32 %v2000_v8, %v2278_v35 }
 0x312   : > { %v2313_v47 = vpop.eup %1592  ;;  %1608 = vpow2.f32 %v883_v18 }
 0x313   : > { %v1015_v42 = vadd.f32 %v1583_v32, %v1014_v40  ;;  %v2317_v55 = vpop.eup %1594  ;;  %v989_v40 = vmul.f32 1.442695, %v869_v21  ;;  %1092 = vmatpush.msra.mxu0 %v1579_v48  ;;  %v824_v32 = vsub.f32 %v1982_v63, %v2278_v35  ;;  %1610 = vpow2.f32 %v993_v58 }
 0x314   : > { %v2321_v11 = vpop.eup %1596  ;;  %v826_v63 = vsub.f32 %v1988_v2, %v2278_v35  ;;  %1612 = vpow2.f32 %v887_v62  ;;  %v895_v48 = vmul.f32 1.442695, %v822_v7  ;;  %v977_v2 = vmul.f32 1.442695, %v863_v60  ;;  %v2613_v7 = vld [vmem:[#allocation13_spill] sm:$0xff] }
 0x315   : > { %v1016_v49 = vadd.f32 %v1585_v44, %v1015_v42  ;;  %v2325_v57 = vpop.eup %1598  ;;  %v985_v44 = vmul.f32 1.442695, %v867_v51  ;;  %1093 = vmatpush.msra.mxu0 %v2284_v54  ;;  %1614 = vpow2.f32 %v989_v40  ;;  %v2612_v54 = vld [vmem:[#allocation11_spill] sm:$0xff]  ;;  %v899_v52 = vmul.f32 1.442695, %v824_v32 }
 0x316   : > { %v828_v21 = vsub.f32 %v2612_v54, %v2278_v35  ;;  %1616 = vpow2.f32 %v891_v5  ;;  %v903_v18 = vmul.f32 1.442695, %v826_v63  ;;  %v832_v8 = vsub.f32 %v2613_v7, %v2278_v35 }
 0x317   : > { %v1017_v45 = vadd.f32 %v1581_v26, %v1016_v49  ;;  %v2330_v49 = vpop.eup %1600  ;;  %1094 = vmatpush.msra.mxu0 %v2275_v31  ;;  %1618 = vpow2.f32 %v985_v44  ;;  %v911_v5 = vmul.f32 1.442695, %v830_v23  ;;  %v836_v44 = vsub.f32 %v2614_v13, %v2278_v35 }
 0x318   : > { %v2336_v26 = vpop.eup %1602  ;;  %1620 = vpow2.f32 %v895_v48  ;;  %v907_v40 = vmul.f32 1.442695, %v828_v21  ;;  %v838_v54 = vsub.f32 %v2024_v19, %v2278_v35  ;;  %v935_v21 = vmul.f32 1.442695, %v842_v15 }
 0x319   : > { %v1018_v12 = vadd.f32 %v1577_v41, %v1017_v45  ;;  %v2340_v41 = vpop.eup %1604  ;;  %1095 = vmatpush.msra.mxu0 %v2269_v22  ;;  %1622 = vpow2.f32 %v981_v38  ;;  %v915_v38 = vmul.f32 1.442695, %v832_v8 }
 0x31a   : > { %v2344_v25 = vpop.eup %1606  ;;  %1116 = vmatpush.msra.mxu1 %v2340_v41  ;;  %1624 = vpow2.f32 %v899_v52  ;;  %v927_v8 = vmul.f32 1.442695, %v838_v54 }
 0x31b   : > { %v1019_v56 = vadd.f32 %v2280_v17, %v1018_v12  ;;  %v2351_v31 = vpop.eup %1608  ;;  %v973_v17 = vmul.f32 1.442695, %v861_v0  ;;  %1096 = vmatpush.msra.mxu0 %v2262_v28  ;;  %1626 = vpow2.f32 %v977_v2  ;;  %v840_v12 = vsub.f32 %v2615_v24, %v2278_v35 }
 0x31c   : > { %v2355_v51 = vpop.eup %1610  ;;  %v1042_v62 = vadd.f32 %v2351_v31, %v2344_v25  ;;  %1117 = vmatpush.msra.mxu1 %v2336_v26  ;;  %1628 = vpow2.f32 %v903_v18  ;;  %v939_v0 = vmul.f32 1.442695, %v844_v34  ;;  %v923_v18 = vmul.f32 1.442695, %v836_v44 }
 0x31d   : > { %v1020_v42 = vadd.f32 %v2301_v30, %v1019_v56  ;;  %v2364_v22 = vpop.eup %1612  ;;  %1097 = vmatpush.msra.mxu0 %v2255_v1  ;;  %1630 = vpow2.f32 %v973_v17  ;;  %v846_v44 = vsub.f32 %v2046_v29, %v2278_v35 }
 0x31e   : > { %v2370_v45 = vpop.eup %1614  ;;  %v1043_v60 = vadd.f32 %v2364_v22, %v1042_v62  ;;  %1118 = vmatpush.msra.mxu1 %v2355_v51  ;;  %1632 = vpow2.f32 %v907_v40 }
 0x31f   : > { %v1021_v58 = vadd.f32 %v2305_v59, %v1020_v42  ;;  %v2376_v28 = vpop.eup %1616  ;;  %1098 = vmatpush.msra.mxu0 %v2248_v6  ;;  %1634 = vpow2.f32 %v911_v5  ;;  %v919_v42 = vmul.f32 1.442695, %v834_v27  ;;  %v931_v6 = vmul.f32 1.442695, %v840_v12 }
 0x320   : > { %v2382_v63 = vpop.eup %1618  ;;  %v1044_v56 = vadd.f32 %v2376_v28, %v1043_v60  ;;  %1119 = vmatpush.msra.mxu1 %v2370_v45  ;;  %1636 = vpow2.f32 %v939_v0  ;;  %v2616_v60 = vld [vmem:[#allocation18_spill] sm:$0xff] }
 0x321   : > { %v1022_v32 = vadd.f32 %v2309_v20, %v1021_v58  ;;  %v2388_v1 = vpop.eup %1620  ;;  %1099 = vmatpush.msra.mxu0 %v2241_v61  ;;  %1638 = vpow2.f32 %v915_v38  ;;  %v2617_v38 = vld [vmem:[#allocation17_spill] sm:$0xff] }
 0x322   : > { %v1623_v52 = vpop.eup %1622  ;;  %v1045_v23 = vadd.f32 %v2388_v1, %v1044_v56  ;;  %1120 = vmatpush.msra.mxu1 %v2382_v63  ;;  %1640 = vpow2.f32 %v935_v21  ;;  %v848_v56 = vsub.f32 %v2617_v38, %v2278_v35  ;;  %v874_v21 = vsub.f32 %v2185_v16, %v2278_v35  ;;  %v2623_v38 = vld [vmem:[#allocation22_spill] sm:$0xff] }
 0x323   : > { %v1023_v48 = vadd.f32 %v2313_v47, %v1022_v32  ;;  %v2396_v17 = vpop.eup %1624  ;;  %1100 = vmatpush.msra.mxu0 %v2234_v53  ;;  %1642 = vpow2.f32 %v919_v42  ;;  %v850_v42 = vsub.f32 %v2054_v33, %v2278_v35  ;;  %v852_v16 = vsub.f32 %v2060_v36, %v2278_v35 }
 0x324   : > { %v1627_v34 = vpop.eup %1626  ;;  %v1046_v58 = vadd.f32 %v2396_v17, %v1045_v23  ;;  %1121 = vmatpush.msra.mxu1 %v1623_v52  ;;  %1644 = vpow2.f32 %v931_v6  ;;  %v943_v23 = vmul.f32 1.442695, %v846_v44  ;;  %v854_v33 = vsub.f32 %v2066_v39, %v2278_v35 }
 0x325   : > { %v1024_v2 = vadd.f32 %v2317_v55, %v1023_v48  ;;  %v2401_v7 = vpop.eup %1628  ;;  %1101 = vmatpush.msra.mxu0 %v2226_v9  ;;  %1646 = vpow2.f32 %v923_v18  ;;  %v947_v18 = vmul.f32 1.442695, %v848_v56  ;;  %v856_v36 = vsub.f32 %v2074_v43, %v2278_v35 }
 0x326   : > { %v1631_v62 = vpop.eup %1630  ;;  %v1047_v27 = vadd.f32 %v2401_v7, %v1046_v58  ;;  %1122 = vmatpush.msra.mxu1 %v1627_v34  ;;  %1648 = vpow2.f32 %v927_v8  ;;  %v999_v58 = vmul.f32 1.442695, %v874_v21  ;;  %v2618_v8 = vld [vmem:[#allocation20_spill] sm:$0xff]  ;;  %v868_v39 = vsub.f32 %v2124_v50, %v2278_v35 }
 0x327   : > { %v1025_v19 = vadd.f32 %v2321_v11, %v1024_v2  ;;  %v2406_v15 = vpop.eup %1632  ;;  %1102 = vmatpush.msra.mxu0 %v2222_v14  ;;  %v876_v14 = vsub.f32 %v2197_v10, %v2278_v35  ;;  %1650 = vpow2.f32 %v943_v23 }
 0x328   : > { %v2408_v40 = vpop.eup %1634  ;;  %v1048_v32 = vadd.f32 %v2406_v15, %v1047_v27  ;;  %1123 = vmatpush.msra.mxu1 %v1631_v62  ;;  %1103 = vmatmul.f32.vlgmr.msra.gmra.mxu0 %v2616_v60 }
 0x329   : > { %v1026_v61 = vadd.f32 %v2325_v57, %v1025_v19  ;;  %v2413_v5 = vpop.eup %1636 }
 0x32a   : > { %v1639_v13 = vpop.eup %1638  ;;  %v1049_v24 = vadd.f32 %v2408_v40, %v1048_v32  ;;  %1124 = vmatpush.msra.mxu1 %v2330_v49  ;;  %1145 = vmatpush.msrb.mxu0 %v2413_v5 }
 0x32b   : > { %v1027_v53 = vadd.f32 %v2330_v49, %v1026_v61  ;;  %v1641_v12 = vpop.eup %1640  ;;  %v955_v61 = vmul.f32 1.442695, %v852_v16 }
 0x32c   : > { %v1643_v0 = vpop.eup %1642  ;;  %v1050_v54 = vadd.f32 %v1639_v13, %v1049_v24  ;;  %1125 = vmatpush.msra.mxu1 %v2325_v57  ;;  %1146 = vmatpush.msrb.mxu0 %v1641_v12  ;;  %v1003_v57 = vmul.f32 1.442695, %v876_v14 }
 0x32d   : > { %v1028_v9 = vadd.f32 %v1631_v62, %v1027_v53  ;;  %v1645_v29 = vpop.eup %1644  ;;  %v959_v53 = vmul.f32 1.442695, %v854_v33 }
 0x32e   : > { %v1647_v49 = vpop.eup %1646  ;;  %v1051_v10 = vadd.f32 %v1643_v0, %v1050_v54  ;;  %1126 = vmatpush.msra.mxu1 %v2321_v11  ;;  %1147 = vmatpush.msrb.mxu0 %v1645_v29  ;;  %v870_v11 = vsub.f32 %v2142_v4, %v2278_v35  ;;  %1652 = vpow2.f32 %v1003_v57 }
 0x32f   : > { %v1029_v48 = vadd.f32 %v1627_v34, %v1028_v9  ;;  %v1649_v6 = vpop.eup %1648  ;;  %v872_v34 = vsub.f32 %v2165_v37, %v2278_v35  ;;  %1654 = vpow2.f32 %v947_v18  ;;  %v2620_v9 = vld [vmem:[#allocation29_spill] sm:$0xff] }
 0x330   : > { %1127 = vmatpush.msra.mxu1 %v2317_v55  ;;  %1148 = vmatpush.msrb.mxu0 %v1649_v6  ;;  %v991_v43 = vmul.f32 1.442695, %v870_v11  ;;  %1656 = vpow2.f32 %v999_v58  ;;  %v864_v44 = vsub.f32 %v2620_v9, %v2278_v35  ;;  %v2460_v24 = vpop.eup %1650 }
 0x331   : > { %v1030_v2 = vadd.f32 %v1623_v52, %v1029_v48  ;;  %v1052_v52 = vadd.f32 %v1647_v49, %v1051_v10  ;;  %1106 = vmatmul.f32.gmra.mxu0 %v2618_v8  ;;  %v995_v55 = vmul.f32 1.442695, %v872_v34  ;;  %v2622_v48 = vld [vmem:[#allocation21_spill] sm:$0xff]  ;;  %v2625_v34 = vld [vmem:[#allocation24_spill] sm:$0xff] }
 0x332   : > { %1128 = vmatpush.msra.mxu1 %v2313_v47  ;;  %1149 = vmatpush.msrb.mxu0 %v1647_v49  ;;  %v858_v47 = vsub.f32 %v2080_v46, %v2278_v35  ;;  %v987_v46 = vmul.f32 1.442695, %v868_v39 }
 0x333   : > { %v1031_v19 = vadd.f32 %v2382_v63, %v1030_v2  ;;  %v951_v63 = vmul.f32 1.442695, %v850_v42  ;;  %v1053_v62 = vadd.f32 %v1649_v6, %v1052_v52 }
 0x334   : > { %1129 = vmatpush.msra.mxu1 %v2309_v20  ;;  %1150 = vmatpush.msrb.mxu0 %v1643_v0  ;;  %v967_v56 = vmul.f32 1.442695, %v858_v47 }
 0x335   : > { %v1032_v37 = vadd.f32 %v2370_v45, %v1031_v19  ;;  %v1054_v27 = vadd.f32 %v1645_v29, %v1053_v62  ;;  %v866_v45 = vsub.f32 %v2110_v3, %v2278_v35  ;;  %1658 = vpow2.f32 %v951_v63 }
 0x336   : > { %1130 = vmatpush.msra.mxu1 %v2305_v59  ;;  %1151 = vmatpush.msrb.mxu0 %v1639_v13  ;;  %1660 = vpow2.f32 %v995_v55  ;;  %v2468_v59 = vpop.eup %1652  ;;  %v2621_v13 = vld [vmem:[#allocation27_spill] sm:$0xff] }
 0x337   : > { %v1033_v4 = vadd.f32 %v2355_v51, %v1032_v37  ;;  %v1055_v32 = vadd.f32 %v1641_v12, %v1054_v27  ;;  %v2619_v51 = vld [vmem:[#allocation25_spill] sm:$0xff]  ;;  %1662 = vpow2.f32 %v955_v61  ;;  %v862_v14 = vsub.f32 %v2621_v13, %v2278_v35  ;;  %v2626_v37 = vld [vmem:[#allocation26_spill] sm:$0xff] }
 0x338   : > { %v860_v20 = vsub.f32 %v2619_v51, %v2278_v35  ;;  %1131 = vmatpush.msra.mxu1 %v2301_v30  ;;  %1152 = vmatpush.msrb.mxu0 %v2408_v40  ;;  %v983_v0 = vmul.f32 1.442695, %v866_v45  ;;  %1664 = vpow2.f32 %v991_v43  ;;  %v979_v40 = vmul.f32 1.442695, %v864_v44 }
 0x339   : > { %v1034_v50 = vadd.f32 %v2336_v26, %v1033_v4  ;;  %v963_v26 = vmul.f32 1.442695, %v856_v36  ;;  %v1056_v12 = vadd.f32 %v2413_v5, %v1055_v32  ;;  %1132 = vmatmul.f32.vlgmr.msra.gmra.mxu1 %v2622_v48  ;;  %1109 = vmatmul.f32.gmra.mxu0 %v2623_v38  ;;  %1666 = vpow2.f32 %v959_v53  ;;  %v2627_v36 = vld [vmem:[#allocation28_spill] sm:$0xff] }
 0x33a   : > { %1174 = vmatpush.msrb.mxu1 %v2468_v59  ;;  %1153 = vmatpush.msrb.mxu0 %v2406_v15  ;;  %1668 = vpow2.f32 %v987_v46  ;;  %v971_v54 = vmul.f32 1.442695, %v860_v20  ;;  %v975_v49 = vmul.f32 1.442695, %v862_v14 }
 0x33b   : > { %v2463_v3 = vadd.f32 %v2340_v41, %v1034_v50  ;;  %v2474_v41 = vpop.eup %1654  ;;  %v1057_v5 = vadd.f32 %v2460_v24, %v1056_v12  ;;  %1670 = vpow2.f32 %v963_v26 }
 0x33c   : > { %v1657_v30 = vpop.eup %1656  ;;  %1154 = vmatpush.msrb.mxu0 %v2401_v7  ;;  %1672 = vpow2.f32 %v983_v0  ;;  %v2624_v7 = vld [vmem:[#allocation23_spill] sm:$0xff] }
 0x33d   : > { %v1659_v35 = vpop.eup %1658  ;;  %v1058_v29 = vadd.f32 %v2474_v41, %v1057_v5  ;;  %1175 = vmatpush.msrb.mxu1 %v1657_v30  ;;  %1674 = vpow2.f32 %v967_v56 }
 0x33e   : > { %v1661_v21 = vpop.eup %1660  ;;  %1155 = vmatpush.msrb.mxu0 %v2396_v17  ;;  %1676 = vpow2.f32 %v979_v40 }
 0x33f   : > { %v1663_v2 = vpop.eup %1662  ;;  %v1059_v42 = vadd.f32 %v1659_v35, %v1058_v29  ;;  %1176 = vmatpush.msrb.mxu1 %v1661_v21  ;;  %1678 = vpow2.f32 %v971_v54 }
 0x340   : > { %v1665_v15 = vpop.eup %1664  ;;  %1156 = vmatpush.msrb.mxu0 %v2388_v1  ;;  %1680 = vpow2.f32 %v975_v49 }
 0x341   : > { %v1667_v23 = vpop.eup %1666  ;;  %v1060_v10 = vadd.f32 %v1663_v2, %v1059_v42  ;;  %1177 = vmatpush.msrb.mxu1 %v1665_v15  ;;  %1112 = vmatmul.f32.gmra.mxu0 %v2625_v34  ;;  %v199_v42 = vld [vmem:[#allocation2 + $0x8] sm:$0xff] }
 0x342   : > { %v1669_v6 = vpop.eup %1668  ;;  %1135 = vmatmul.f32.gmra.mxu1 %v2624_v7  ;;  %1157 = vmatpush.msrb.mxu0 %v2376_v28 }
 0x343   : > { %v1671_v57 = vpop.eup %1670  ;;  %v1061_v19 = vadd.f32 %v1667_v23, %v1060_v10  ;;  %1178 = vmatpush.msrb.mxu1 %v1669_v6 }
 0x344   : > { %v1673_v17 = vpop.eup %1672  ;;  %1158 = vmatpush.msrb.mxu0 %v2364_v22 }
 0x345   : > { %v1675_v16 = vpop.eup %1674  ;;  %v1062_v18 = vadd.f32 %v1671_v57, %v1061_v19  ;;  %1179 = vmatpush.msrb.mxu1 %v1673_v17 }
 0x346   : > { %v1677_v52 = vpop.eup %1676  ;;  %1159 = vmatpush.msrb.mxu0 %v2351_v31 }
 0x347   : > { %v1679_v33 = vpop.eup %1678  ;;  %v1063_v1 = vadd.f32 %v1675_v16, %v1062_v18  ;;  %1180 = vmatpush.msrb.mxu1 %v1677_v52 }
 0x348   : > { %v1681_v11 = vpop.eup %1680  ;;  %1160 = vmatpush.msrb.mxu0 %v2344_v25 }
 0x349   : > { %v1064_v58 = vadd.f32 %v1679_v33, %v1063_v1  ;;  %1181 = vmatpush.msrb.mxu1 %v1681_v11  ;;  %1161 = vmatmul.f32.vlgmr.msrb.gmra.mxu0 %v2616_v60 }
 0x34a   : > { %1138 = vmatmul.f32.gmra.mxu1 %v2626_v37 }
 0x34b   : > { %v1065_v28 = vadd.f32 %v1681_v11, %v1064_v58  ;;  %1182 = vmatpush.msrb.mxu1 %v1679_v33 }
 0x34d   : > { %v1066_v63 = vadd.f32 %v1677_v52, %v1065_v28  ;;  %1183 = vmatpush.msrb.mxu1 %v1675_v16  ;;  %v201_v52 = vld [vmem:[#allocation2 + $0x18] sm:$0xff] }
 0x34f   : > { %v1067_v22 = vadd.f32 %v1673_v17, %v1066_v63  ;;  %1184 = vmatpush.msrb.mxu1 %v1671_v57 }
 0x351   : > { %v1068_v62 = vadd.f32 %v1669_v6, %v1067_v22  ;;  %1185 = vmatpush.msrb.mxu1 %v1667_v23  ;;  %1164 = vmatmul.f32.gmra.mxu0 %v2618_v8  ;;  %v1036_v8 = vrot.slane %v2463_v3, 4 }
 0x352   : > { %1141 = vmatmul.f32.gmra.mxu1 %v2627_v36 }
 0x353   : > { %v1069_v31 = vadd.f32 %v1665_v15, %v1068_v62  ;;  %1186 = vmatpush.msrb.mxu1 %v1663_v2  ;;  %v1037_v4 = vadd.f32 %v1036_v8, %v2463_v3 }
 0x355   : > { %v1070_v39 = vadd.f32 %v1661_v21, %v1069_v31  ;;  %1187 = vmatpush.msrb.mxu1 %v1659_v35  ;;  %v1038_v61 = vrot.slane %v1037_v4, 2  ;;  %v198_v21 = vld [vmem:[#allocation2] sm:$0xff] }
 0x357   : > { %v1071_v25 = vadd.f32 %v1657_v30, %v1070_v39  ;;  %1188 = vmatpush.msrb.mxu1 %v2474_v41  ;;  %v1039_v47 = vadd.f32 %v1038_v61, %v1037_v4 }
 0x359   : > { %v1072_v60 = vadd.f32 %v2468_v59, %v1071_v25  ;;  %1189 = vmatpush.msrb.mxu1 %v2460_v24  ;;  %1167 = vmatmul.f32.gmra.mxu0 %v2623_v38  ;;  %v1040_v45 = vrot.slane %v1039_v47, 1 }
 0x35a   : > { %1190 = vmatmul.f32.vlgmr.msrb.gmra.mxu1 %v2622_v48 }
 0x35b   : > { %v1041_v50 = vadd.f32 %v1040_v45, %v1039_v47  ;;  %v1073_v9 = vrot.slane %v1072_v60, 4 }
 0x35d   : > { %1682 = vrcp.f32 %v1041_v50  ;;  %v1074_v24 = vadd.f32 %v1073_v9, %v1072_v60 }
 0x35f   : > { %v1075_v12 = vrot.slane %v1074_v24, 2 }
 0x361   : > { %1170 = vmatmul.f32.gmra.mxu0 %v2625_v34  ;;  %v1076_v41 = vadd.f32 %v1075_v12, %v1074_v24 }
 0x362   : > { %1193 = vmatmul.f32.gmra.mxu1 %v2624_v7  ;;  %v200_v7 = vld [vmem:[#allocation2 + $0x10] sm:$0xff] }
 0x363   : > { %v1683_v51 = vpop.eup %1682  ;;  %v1077_v40 = vrot.slane %v1076_v41, 1 }
 0x364   : > { %v1081_v46 = vmul.f32 %v1683_v51, %v1041_v50 }
 0x365   : > { %v1078_v49 = vadd.f32 %v1077_v40, %v1076_v41 }
 0x366   : > { %v1083_v26 = vsub.f32 2.0, %v1081_v46 }
 0x367   : > { %1684 = vrcp.f32 %v1078_v49 }
 0x368   : > { %v1085_v3 = vmul.f32 %v1683_v51, %v1083_v26 }
 0x36a   : > { %1196 = vmatmul.f32.gmra.mxu1 %v2626_v37 }
 0x36d   : > { %v1685_v23 = vpop.eup %1684 }
 0x36e   : > { %v1082_v6 = vmul.f32 %v1685_v23, %v1078_v49 }
 0x370   : > { %v1084_v34 = vsub.f32 2.0, %v1082_v6 }
 0x372   : > { %1199 = vmatmul.f32.gmra.mxu1 %v2627_v36  ;;  %v1086_v17 = vmul.f32 %v1685_v23, %v1084_v34 }
 0x3a5   : > { %v1104_v55 = vpop.f32.mrf.mxu0 }
 0x3ae   : > { %v1107_v27 = vpop.f32.mrf.mxu0 }
 0x3b6   : > { %v1133_v43 = vpop.f32.mrf.mxu1  ;;  %v1110_v53 = vpop.f32.mrf.mxu0 }
 0x3b7   : > { %v1134_v56 = vadd.f32 %v1133_v43, %v1104_v55 }
 0x3b9   : > { %v1203_v54 = vmul.f32 %v1134_v56, %v1085_v3 }
 0x3be   : > { %v1113_v20 = vpop.f32.mrf.mxu0 }
 0x3bf   : > { %v1136_v32 = vpop.f32.mrf.mxu1 }
 0x3c0   : > { %v1137_v48 = vadd.f32 %v1136_v32, %v1107_v27 }
 0x3c2   : > { %v1205_v30 = vmul.f32 %v1137_v48, %v1085_v3 }
 0x3c6   : > { %v1162_v13 = vpop.f32.mrf.mxu0 }
 0x3c7   : > { %v1139_v44 = vpop.f32.mrf.mxu1 }
 0x3c8   : > { %v1140_v14 = vadd.f32 %v1139_v44, %v1110_v53 }
 0x3ca   : > { %v1207_v5 = vmul.f32 %v1140_v14, %v1085_v3 }
 0x3ce   : > { %v1165_v29 = vpop.f32.mrf.mxu0 }
 0x3cf   : > { %v1142_v59 = vpop.f32.mrf.mxu1 }
 0x3d0   : > { %v1143_v0 = vadd.f32 %v1142_v59, %v1113_v20 }
 0x3d2   : > { %v1209_v38 = vmul.f32 %v1143_v0, %v1085_v3 }
 0x3d4   : > { %1235 = vmatpush.msra.mxu0 %v1209_v38 }
 0x3d6   : > { %1236 = vmatpush.msra.mxu0 %v1207_v5  ;;  %v1168_v15 = vpop.f32.mrf.mxu0 }
 0x3d7   : > { %v1191_v35 = vpop.f32.mrf.mxu1 }
 0x3d8   : > { %1237 = vmatpush.msra.mxu0 %v1205_v30  ;;  %v1192_v11 = vadd.f32 %v1191_v35, %v1162_v13 }
 0x3da   : > { %1238 = vmatpush.msra.mxu0 %v1203_v54  ;;  %v1204_v28 = vmul.f32 %v1192_v11, %v1086_v17 }
 0x3db   : > { %1476 = vmatmul.msk.f32.vlgmr.msra.gmra.mxu0 %vm210_vm0, %v198_v21 }
 0x3de   : > { %v1171_v57 = vpop.f32.mrf.mxu0 }
 0x3df   : > { %v1194_v2 = vpop.f32.mrf.mxu1 }
 0x3e0   : > { %v1195_v33 = vadd.f32 %v1194_v2, %v1165_v29 }
 0x3e2   : > { %v1206_v37 = vmul.f32 %v1195_v33, %v1086_v17 }
 0x3e3   : > { %1477 = vmatmul.msk.f32.gmra.mxu0 %vm210_vm0, %v199_v42 }
 0x3e7   : > { %v1197_v10 = vpop.f32.mrf.mxu1 }
 0x3e8   : > { %v1198_v16 = vadd.f32 %v1197_v10, %v1168_v15 }
 0x3ea   : > { %v1208_v58 = vmul.f32 %v1198_v16, %v1086_v17 }
 0x3eb   : > { %1478 = vmatmul.msk.f32.gmra.mxu0 %vm210_vm0, %v200_v7 }
 0x3ef   : > { %v1200_v19 = vpop.f32.mrf.mxu1 }
 0x3f0   : > { %v1201_v18 = vadd.f32 %v1200_v19, %v1171_v57 }
 0x3f2   : > { %v1210_v1 = vmul.f32 %v1201_v18, %v1086_v17 }
 0x3f3   : > { %1479 = vmatmul.msk.f32.gmra.mxu0 %vm210_vm0, %v201_v52 }
 0x3f4   : > { %1264 = vmatpush.msra.mxu1 %v1210_v1 }
 0x3f6   : > { %1265 = vmatpush.msra.mxu1 %v1208_v58 }
 0x3f8   : > { %1266 = vmatpush.msra.mxu1 %v1206_v37 }
 0x3fa   : > { %1267 = vmatpush.msra.mxu1 %v1204_v28 }
 0x3fb   : > { %1480 = vmatmul.msk.f32.vlgmr.msra.gmra.mxu1 %vm210_vm0, %v198_v21 }
 0x403   : > { %1481 = vmatmul.msk.f32.gmra.mxu1 %vm210_vm0, %v199_v42 }
 0x40b   : > { %1482 = vmatmul.msk.f32.gmra.mxu1 %vm210_vm0, %v200_v7 }
 0x413   : > { %1483 = vmatmul.msk.f32.gmra.mxu1 %vm210_vm0, %v201_v52 }
 0x458   : > { %v1240_v63 = vpop.f32.mrf.mxu0 }
 0x459   : > { %1281 = vst [vmem:[%s180_s26] sm:$0xff] %v1240_v63 }
 0x460   : > { %v1243_v22 = vpop.f32.mrf.mxu0 }
 0x461   : > { %1283 = vst [vmem:[%s180_s26 + $0x10] sm:$0xff] %v1243_v22 }
 0x468   : > { %v1246_v62 = vpop.f32.mrf.mxu0 }
 0x469   : > { %1285 = vst [vmem:[%s180_s26 + $0x20] sm:$0xff] %v1246_v62 }
 0x470   : > { %v1249_v36 = vpop.f32.mrf.mxu0 }
 0x471   : > { %1287 = vst [vmem:[%s180_s26 + $0x30] sm:$0xff] %v1249_v36 }
 0x478   : > { %v1269_v31 = vpop.f32.mrf.mxu1 }
 0x479   : > { %1282 = vst [vmem:[%s180_s26 + $0x8] sm:$0xff] %v1269_v31 }
 0x480   : > { %v1272_v39 = vpop.f32.mrf.mxu1 }
 0x481   : > { %1284 = vst [vmem:[%s180_s26 + $0x18] sm:$0xff] %v1272_v39 }
 0x488   : > { %v1275_v25 = vpop.f32.mrf.mxu1 }
 0x489   : > { %1286 = vst [vmem:[%s180_s26 + $0x28] sm:$0xff] %v1275_v25 }
 0x490   : > { %v1278_v60 = vpop.f32.mrf.mxu1 }
 0x491   : > { %1288 = vst [vmem:[%s180_s26 + $0x38] sm:$0xff] %v1278_v60 }
 0x492   : > { %1743 = shalt.err (!%p1740_p8)
}
 0x493   : > { %s1787_s19 = smov 256   ;;  %s1788_s20 = smov 16  }
 0x494   : > { %1503 = dma.vmem_to_hbm [thread:$0]  (%p1847_p5), %s1303_s4, 1024, %s1305_s5, %s1290_s6, %s1787_s19, %s1787_s19, %s1788_s20  }
 0x495 PF: > { %p1515_p9 = scmp.ge.s32.totalorder %s1782_s15, 2  ;;  %s1319_s24 = sand.u32 1, %s1770_s12  }
 0x496   : > { %s1320_s25 = scalar_lea.sflag [#allocation4], %s1319_s24 }
 0x497   : > { %p1510_p10 = pnand %p1515_p9, %p1851_p6 }
 0x499   : > { %p1511_p11 = pneg %p1510_p10 }
 0x49b   : > { %1765 = dma.done.wait (%p1511_p11), %s1320_s25, 1024  }
 0x49c   : > { %1767 = vsyncadd (%p1511_p11), %s1320_s25, 4294966272  ;;  %p14_p12 = scmp.ge.s32.totalorder %s1834_s18, 4   ;;  %s2628_s12 = smov %s1774_s13 }
 0x49d   : > { %s2629_s13 = smov %s1778_s14  ;;  %s2630_s14 = smov %s1845_s21 }
 0x49e   : > { %s2631_s15 = smov %s1834_s18  ;;  %16 = sbr.rel (!%p14_p12) target bundleno = 4 (0x4), region = 72 }
 0x4a3   :  { %1326 = vsyncpa [#allocation3], 1 }
 0x4a4   :  { %1328 = vsyncpa [#allocation3 + $0x1], 1 }
 0x4a5   :  { %1329 = vsyncpa [#allocation4], 1 }
 0x4a6   :  { %1331 = vsyncpa [#allocation4 + $0x1], 1 }

</bundles_post_ra>
